<compile_context>
chip_gen: v7x
topology: tpu7x:2x2x1
jax: 0.10.0
libtpu: 0.0.40
codegen_flags: <defaults>
</compile_context>

<pallas_src>
import functools

import jax
import jax.numpy as jnp
from jax.experimental import pallas as pl
from jax.experimental.pallas import tpu as pltpu


def _conv_model_kernel(cols1_ref, w1_ref, b1_ref, w2_ref, b2_ref, o_ref, *,
                       bt, n_even, L2, L3, L4, K2, pad2, mm_dtype):
    # cols1_ref: (L1*bt, Kc1)  -- rows are (l_perm, b), even l-positions first.
    # w1_ref: (Kc1, C1), w2_ref: (Kc2, C2)  (tap-concatenated, zero-padded K).
    # b1_ref: (1, C1) f32, b2_ref: (1, C2) f32.  o_ref: (bt, C2, L4) f32 (NCL).

    # ---- Conv1d(E -> 24, k=3): one MXU matmul, M = L1*bt, f32 accumulation ----
    a1 = jnp.dot(cols1_ref[...], w1_ref[...],
                 preferred_element_type=jnp.float32)
    a1 = a1 + b1_ref[...]                                        # (L1*bt, C1)

    # ---- MaxPool1d(3, 2) + ReLU ----
    # Even l-positions occupy rows [0, n_even*bt), odd ones the rest, so window
    # p = max(E[p], O[p], E[p+1]) is three unit-stride block slices (no strided
    # ref reads, no scratch).
    e_rows = a1[:n_even * bt, :]
    o_rows = a1[n_even * bt:, :]
    m1 = jnp.maximum(jnp.maximum(e_rows[:L2 * bt, :], o_rows[:L2 * bt, :]),
                     e_rows[bt:(L2 + 1) * bt, :])
    p1 = jnp.maximum(m1, 0.0).astype(mm_dtype)                   # (L2*bt, C1)

    # ---- Conv1d(24 -> C2, k=5): in-kernel im2col via row shifts of k*bt ----
    taps = [p1[k * bt:(k + L3) * bt, :] for k in range(K2)]
    if pad2:
        taps.append(jnp.zeros((L3 * bt, pad2), mm_dtype))        # lane-align K
    cols2 = jnp.concatenate(taps, axis=-1)                       # (L3*bt, Kc2)
    a2 = jnp.dot(cols2, w2_ref[...],
                 preferred_element_type=jnp.float32)
    a2 = a2 + b2_ref[...]                                        # (L3*bt, C2)

    # ---- MaxPool1d(5, 2) + ReLU, assembled directly in NCL order ----
    wins = []
    for p in range(L4):
        w = a2[2 * p * bt:(2 * p + 1) * bt, :]
        for j in range(1, 5):
            w = jnp.maximum(w, a2[(2 * p + j) * bt:(2 * p + j + 1) * bt, :])
        wins.append(jnp.maximum(w, 0.0))                         # (bt, C2)
    o_ref[...] = jnp.stack(wins, axis=-1)                        # (bt, C2, L4)


def _round_up(v, m):
    return (v + m - 1) // m * m


def conv_model_forward(x, w1, b1, w2, b2, *, b_tile=None,
                       matmul_dtype=jnp.float32):
    """x: (batch, seq, emb) f32 — same input as ConvModel.forward.

    w1: (24, emb, 3), b1: (24,), w2: (C2, 24, 5), b2: (C2,)
    Returns (batch, C2, L_out) f32, matching the PyTorch module (NCL).
    """
    B, S, E = x.shape
    C1, K1 = w1.shape[0], w1.shape[2]          # 24, 3
    C2, K2 = w2.shape[0], w2.shape[2]          # out_channels, 5
    L1 = S - (K1 - 1)                          # conv1 (valid)
    L2 = (L1 - 3) // 2 + 1                     # maxpool(3, 2)
    L3 = L2 - (K2 - 1)                         # conv2 (valid)
    L4 = (L3 - 5) // 2 + 1                     # maxpool(5, 2)
    assert L4 >= 1, "sequence too short for this conv stack"
    n_even = (L1 + 1) // 2                     # count of even l-positions

    # Single block by default: best for v5e/v6e (one TC) and for small batches
    # on v7x.  For very large B, pass b_tile (e.g. cdiv(B, 2) on v7x) — each
    # block is only ~L1*b_tile*Kc1*dtype bytes, far below scoped VMEM limits.
    if b_tile is None:
        b_tile = B
    b_tile = max(1, min(b_tile, B))
    n_blocks = pl.cdiv(B, b_tile)
    B_pad = n_blocks * b_tile

    Kc1 = _round_up(K1 * E, 128)               # lane-aligned contraction dims
    Kc2 = _round_up(K2 * C1, 128)
    pad2 = Kc2 - K2 * C1

    xd = x.astype(matmul_dtype)
    if B_pad != B:
        xd = jnp.pad(xd, ((0, B_pad - B), (0, 0), (0, 0)))

    # ---- conv1 im2col hoisted to the wrapper (free XLA work) ----
    # cols1[blk, i*b_tile + b, k*E + e] = x[blk*b_tile + b, perm(i) + k, e]
    # where perm lists even l-positions first (enables unit-stride pooling).
    xb = xd.reshape(n_blocks, b_tile, S, E)
    cols1 = jnp.concatenate([xb[:, :, k:k + L1, :] for k in range(K1)],
                            axis=-1)                       # (nb, bt, L1, K1*E)
    perm = list(range(0, L1, 2)) + list(range(1, L1, 2))   # evens then odds
    cols1 = cols1[:, :, perm, :]
    cols1 = jnp.transpose(cols1, (0, 2, 1, 3))             # (nb, L1, bt, K1*E)
    cols1 = cols1.reshape(n_blocks, L1 * b_tile, K1 * E)
    if Kc1 > K1 * E:
        cols1 = jnp.pad(cols1, ((0, 0), (0, 0), (0, Kc1 - K1 * E)))

    # Tap-concatenated weights: w_cat[k*Cin + c_in, c_out] = w_torch[c_out, c_in, k].
    w1_cat = jnp.transpose(w1, (2, 1, 0)).reshape(K1 * E, C1).astype(matmul_dtype)
    if Kc1 > K1 * E:
        w1_cat = jnp.pad(w1_cat, ((0, Kc1 - K1 * E), (0, 0)))
    w2_cat = jnp.transpose(w2, (2, 1, 0)).reshape(K2 * C1, C2).astype(matmul_dtype)
    if pad2:
        w2_cat = jnp.pad(w2_cat, ((0, pad2), (0, 0)))
    b1r = b1.reshape(1, C1).astype(jnp.float32)
    b2r = b2.reshape(1, C2).astype(jnp.float32)

    kernel = functools.partial(_conv_model_kernel, bt=b_tile, n_even=n_even,
                               L2=L2, L3=L3, L4=L4, K2=K2, pad2=pad2,
                               mm_dtype=matmul_dtype)

    out = pl.pallas_call(
        kernel,
        out_shape=jax.ShapeDtypeStruct((n_blocks, b_tile, C2, L4), jnp.float32),
        grid_spec=pltpu.PrefetchScalarGridSpec(
            num_scalar_prefetch=0,
            grid=(n_blocks,),
            in_specs=[
                pl.BlockSpec((None, L1 * b_tile, Kc1), lambda i: (i, 0, 0)),
                pl.BlockSpec((Kc1, C1), lambda i: (0, 0)),
                pl.BlockSpec((1, C1), lambda i: (0, 0)),
                pl.BlockSpec((Kc2, C2), lambda i: (0, 0)),
                pl.BlockSpec((1, C2), lambda i: (0, 0)),
            ],
            out_specs=pl.BlockSpec((None, b_tile, C2, L4),
                                   lambda i: (i, 0, 0, 0)),
        ),
        compiler_params=pltpu.CompilerParams(
            dimension_semantics=("parallel",)),
    )(cols1, w1_cat, b1r, w2_cat, b2r)

    out = out.reshape(B_pad, C2, L4)[:B]       # padded rows (if any) dropped
    return out


def _reference(x, w1, b1, w2, b2):
    """Pure-JAX/XLA f32 reference mirroring the PyTorch module."""
    xc = jnp.transpose(x, (0, 2, 1))           # (B, emb, seq) == x.permute(0,2,1)
    y = jax.lax.conv_general_dilated(
        xc, w1, (1,), "VALID", dimension_numbers=("NCH", "OIH", "NCH"),
        precision=jax.lax.Precision.HIGHEST)
    y = y + b1[None, :, None]
    y = jax.lax.reduce_window(y, -jnp.inf, jax.lax.max,
                              (1, 1, 3), (1, 1, 2), "VALID")
    y = jnp.maximum(y, 0.0)
    y = jax.lax.conv_general_dilated(
        y, w2, (1,), "VALID", dimension_numbers=("NCH", "OIH", "NCH"),
        precision=jax.lax.Precision.HIGHEST)
    y = y + b2[None, :, None]
    y = jax.lax.reduce_window(y, -jnp.inf, jax.lax.max,
                              (1, 1, 5), (1, 1, 2), "VALID")
    return jnp.maximum(y, 0.0)


if __name__ == "__main__":
    # Small, module-consistent shapes: batch=8, seq=32, emb_size=32, out=8.
    batch, seq, emb, out_channels = 8, 32, 32, 8

    key = jax.random.PRNGKey(0)
    kx, kw1, kb1, kw2, kb2 = jax.random.split(key, 5)

    x = jax.random.normal(kx, (batch, seq, emb), jnp.float32)
    w1 = 0.1 * jax.random.normal(kw1, (24, emb, 3), jnp.float32)
    b1 = 0.1 * jax.random.normal(kb1, (24,), jnp.float32)
    w2 = 0.1 * jax.random.normal(kw2, (out_channels, 24, 5), jnp.float32)
    b2 = 0.1 * jax.random.normal(kb2, (out_channels,), jnp.float32)

    ref = jax.block_until_ready(_reference(x, w1, b1, w2, b2))

    # Default path: f32 matmul operands (tight parity with the f32 module).
    out = jax.block_until_ready(conv_model_forward(x, w1, b1, w2, b2))
    assert out.shape == ref.shape, (out.shape, ref.shape)
    assert jnp.allclose(out, ref, atol=2e-2, rtol=2e-2), "f32 path mismatch"

    # Optional bf16 MXU-operand path (f32 accumulation); looser tolerance.
    out_bf16 = jax.block_until_ready(
        conv_model_forward(x, w1, b1, w2, b2, matmul_dtype=jnp.bfloat16))
    assert jnp.allclose(out_bf16, ref, atol=7e-2, rtol=7e-2), "bf16 path mismatch"

    print("KERNEL_OK")
</pallas_src>

<mosaic_0001>
module attributes {stable_mosaic.version = 11 : i64} {
  func.func @_conv_model_kernel(%arg0: i32, %arg1: memref<1x240x128xf32, #tpu.memory_space<vmem>>, %arg2: memref<128x24xf32, #tpu.memory_space<vmem>>, %arg3: memref<1x24xf32, #tpu.memory_space<vmem>>, %arg4: memref<128x8xf32, #tpu.memory_space<vmem>>, %arg5: memref<1x8xf32, #tpu.memory_space<vmem>>, %arg6: memref<1x8x8x3xf32, #tpu.memory_space<vmem>>) attributes {dimension_semantics = [#tpu.dimension_semantics<parallel>], iteration_bounds = array<i64: 1>, scalar_prefetch = 0 : i64, scratch_operands = 0 : i64, tpu.core_type = #tpu.core_type<tc>, window_params = [{transform_indices = @transform_0, window_bounds = array<i64: 1, 240, 128>}, {pipeline_mode = #tpu.pipeline_mode<synchronous>, transform_indices = @transform_1, window_bounds = array<i64: 128, 24>}, {pipeline_mode = #tpu.pipeline_mode<synchronous>, transform_indices = @transform_2, window_bounds = array<i64: 1, 24>}, {pipeline_mode = #tpu.pipeline_mode<synchronous>, transform_indices = @transform_3, window_bounds = array<i64: 128, 8>}, {pipeline_mode = #tpu.pipeline_mode<synchronous>, transform_indices = @transform_4, window_bounds = array<i64: 1, 8>}, {transform_indices = @transform_5, window_bounds = array<i64: 1, 8, 8, 3>}]} {
    %c0 = arith.constant 0 : index
    %c0_0 = arith.constant 0 : index
    %c0_1 = arith.constant 0 : index
    %0 = vector.load %arg1[%c0, %c0_0, %c0_1] : memref<1x240x128xf32, #tpu.memory_space<vmem>>, vector<1x240x128xf32>
    %1 = vector.shape_cast %0 : vector<1x240x128xf32> to vector<240x128xf32>
    %c0_2 = arith.constant 0 : index
    %c0_3 = arith.constant 0 : index
    %2 = vector.load %arg2[%c0_2, %c0_3] : memref<128x24xf32, #tpu.memory_space<vmem>>, vector<128x24xf32>
    %cst = arith.constant dense<0.000000e+00> : vector<240x24xf32>
    %3 = tpu.matmul %1, %2, %cst {dimension_numbers = #tpu.dot_dimension_numbers<[1], [0], [0], [1], [0, 0, 1, 1], [], []>} : vector<240x128xf32>, vector<128x24xf32>, vector<240x24xf32> -> vector<240x24xf32>
    %c0_4 = arith.constant 0 : index
    %c0_5 = arith.constant 0 : index
    %4 = vector.load %arg3[%c0_4, %c0_5] : memref<1x24xf32, #tpu.memory_space<vmem>>, vector<1x24xf32>
    %5 = vector.broadcast %4 : vector<1x24xf32> to vector<240x24xf32>
    %6 = arith.addf %3, %5 : vector<240x24xf32>
    %7 = vector.extract_strided_slice %6 {offsets = [0, 0], sizes = [120, 24], strides = [1, 1]} : vector<240x24xf32> to vector<120x24xf32>
    %8 = vector.extract_strided_slice %6 {offsets = [120, 0], sizes = [120, 24], strides = [1, 1]} : vector<240x24xf32> to vector<120x24xf32>
    %9 = vector.extract_strided_slice %7 {offsets = [0, 0], sizes = [112, 24], strides = [1, 1]} : vector<120x24xf32> to vector<112x24xf32>
    %10 = vector.extract_strided_slice %8 {offsets = [0, 0], sizes = [112, 24], strides = [1, 1]} : vector<120x24xf32> to vector<112x24xf32>
    %11 = arith.maximumf %9, %10 : vector<112x24xf32>
    %12 = vector.extract_strided_slice %7 {offsets = [8, 0], sizes = [112, 24], strides = [1, 1]} : vector<120x24xf32> to vector<112x24xf32>
    %13 = arith.maximumf %11, %12 : vector<112x24xf32>
    %cst_6 = arith.constant 0.000000e+00 : f32
    %14 = vector.broadcast %cst_6 : f32 to vector<112x24xf32>
    %15 = arith.maximumf %13, %14 : vector<112x24xf32>
    %16 = vector.extract_strided_slice %15 {offsets = [0, 0], sizes = [80, 24], strides = [1, 1]} : vector<112x24xf32> to vector<80x24xf32>
    %17 = vector.extract_strided_slice %15 {offsets = [8, 0], sizes = [80, 24], strides = [1, 1]} : vector<112x24xf32> to vector<80x24xf32>
    %18 = vector.extract_strided_slice %15 {offsets = [16, 0], sizes = [80, 24], strides = [1, 1]} : vector<112x24xf32> to vector<80x24xf32>
    %19 = vector.extract_strided_slice %15 {offsets = [24, 0], sizes = [80, 24], strides = [1, 1]} : vector<112x24xf32> to vector<80x24xf32>
    %20 = vector.extract_strided_slice %15 {offsets = [32, 0], sizes = [80, 24], strides = [1, 1]} : vector<112x24xf32> to vector<80x24xf32>
    %cst_7 = arith.constant 0.000000e+00 : f32
    %21 = vector.broadcast %cst_7 : f32 to vector<80x8xf32>
    %22 = tpu.concatenate %16, %17, %18, %19, %20, %21 in 1 : vector<80x24xf32>, vector<80x24xf32>, vector<80x24xf32>, vector<80x24xf32>, vector<80x24xf32>, vector<80x8xf32> -> vector<80x128xf32>
    %c0_8 = arith.constant 0 : index
    %c0_9 = arith.constant 0 : index
    %23 = vector.load %arg4[%c0_8, %c0_9] : memref<128x8xf32, #tpu.memory_space<vmem>>, vector<128x8xf32>
    %cst_10 = arith.constant dense<0.000000e+00> : vector<80x8xf32>
    %24 = tpu.matmul %22, %23, %cst_10 {dimension_numbers = #tpu.dot_dimension_numbers<[1], [0], [0], [1], [0, 0, 1, 1], [], []>} : vector<80x128xf32>, vector<128x8xf32>, vector<80x8xf32> -> vector<80x8xf32>
    %c0_11 = arith.constant 0 : index
    %c0_12 = arith.constant 0 : index
    %25 = vector.load %arg5[%c0_11, %c0_12] : memref<1x8xf32, #tpu.memory_space<vmem>>, vector<1x8xf32>
    %26 = vector.broadcast %25 : vector<1x8xf32> to vector<80x8xf32>
    %27 = arith.addf %24, %26 : vector<80x8xf32>
    %28 = vector.extract_strided_slice %27 {offsets = [0, 0], sizes = [8, 8], strides = [1, 1]} : vector<80x8xf32> to vector<8x8xf32>
    %29 = vector.extract_strided_slice %27 {offsets = [8, 0], sizes = [8, 8], strides = [1, 1]} : vector<80x8xf32> to vector<8x8xf32>
    %30 = arith.maximumf %28, %29 : vector<8x8xf32>
    %31 = vector.extract_strided_slice %27 {offsets = [16, 0], sizes = [8, 8], strides = [1, 1]} : vector<80x8xf32> to vector<8x8xf32>
    %32 = arith.maximumf %30, %31 : vector<8x8xf32>
    %33 = vector.extract_strided_slice %27 {offsets = [24, 0], sizes = [8, 8], strides = [1, 1]} : vector<80x8xf32> to vector<8x8xf32>
    %34 = arith.maximumf %32, %33 : vector<8x8xf32>
    %35 = vector.extract_strided_slice %27 {offsets = [32, 0], sizes = [8, 8], strides = [1, 1]} : vector<80x8xf32> to vector<8x8xf32>
    %36 = arith.maximumf %34, %35 : vector<8x8xf32>
    %cst_13 = arith.constant 0.000000e+00 : f32
    %37 = vector.broadcast %cst_13 : f32 to vector<8x8xf32>
    %38 = arith.maximumf %36, %37 : vector<8x8xf32>
    %39 = vector.extract_strided_slice %27 {offsets = [16, 0], sizes = [8, 8], strides = [1, 1]} : vector<80x8xf32> to vector<8x8xf32>
    %40 = vector.extract_strided_slice %27 {offsets = [24, 0], sizes = [8, 8], strides = [1, 1]} : vector<80x8xf32> to vector<8x8xf32>
    %41 = arith.maximumf %39, %40 : vector<8x8xf32>
    %42 = vector.extract_strided_slice %27 {offsets = [32, 0], sizes = [8, 8], strides = [1, 1]} : vector<80x8xf32> to vector<8x8xf32>
    %43 = arith.maximumf %41, %42 : vector<8x8xf32>
    %44 = vector.extract_strided_slice %27 {offsets = [40, 0], sizes = [8, 8], strides = [1, 1]} : vector<80x8xf32> to vector<8x8xf32>
    %45 = arith.maximumf %43, %44 : vector<8x8xf32>
    %46 = vector.extract_strided_slice %27 {offsets = [48, 0], sizes = [8, 8], strides = [1, 1]} : vector<80x8xf32> to vector<8x8xf32>
    %47 = arith.maximumf %45, %46 : vector<8x8xf32>
    %cst_14 = arith.constant 0.000000e+00 : f32
    %48 = vector.broadcast %cst_14 : f32 to vector<8x8xf32>
    %49 = arith.maximumf %47, %48 : vector<8x8xf32>
    %50 = vector.extract_strided_slice %27 {offsets = [32, 0], sizes = [8, 8], strides = [1, 1]} : vector<80x8xf32> to vector<8x8xf32>
    %51 = vector.extract_strided_slice %27 {offsets = [40, 0], sizes = [8, 8], strides = [1, 1]} : vector<80x8xf32> to vector<8x8xf32>
    %52 = arith.maximumf %50, %51 : vector<8x8xf32>
    %53 = vector.extract_strided_slice %27 {offsets = [48, 0], sizes = [8, 8], strides = [1, 1]} : vector<80x8xf32> to vector<8x8xf32>
    %54 = arith.maximumf %52, %53 : vector<8x8xf32>
    %55 = vector.extract_strided_slice %27 {offsets = [56, 0], sizes = [8, 8], strides = [1, 1]} : vector<80x8xf32> to vector<8x8xf32>
    %56 = arith.maximumf %54, %55 : vector<8x8xf32>
    %57 = vector.extract_strided_slice %27 {offsets = [64, 0], sizes = [8, 8], strides = [1, 1]} : vector<80x8xf32> to vector<8x8xf32>
    %58 = arith.maximumf %56, %57 : vector<8x8xf32>
    %cst_15 = arith.constant 0.000000e+00 : f32
    %59 = vector.broadcast %cst_15 : f32 to vector<8x8xf32>
    %60 = arith.maximumf %58, %59 : vector<8x8xf32>
    %61 = vector.shape_cast %38 : vector<8x8xf32> to vector<8x8x1xf32>
    %62 = vector.shape_cast %49 : vector<8x8xf32> to vector<8x8x1xf32>
    %63 = vector.shape_cast %60 : vector<8x8xf32> to vector<8x8x1xf32>
    %64 = tpu.concatenate %61, %62, %63 in 2 : vector<8x8x1xf32>, vector<8x8x1xf32>, vector<8x8x1xf32> -> vector<8x8x3xf32>
    %c0_16 = arith.constant 0 : index
    %c0_17 = arith.constant 0 : index
    %c0_18 = arith.constant 0 : index
    %c0_19 = arith.constant 0 : index
    %65 = vector.load %arg6[%c0_16, %c0_17, %c0_18, %c0_19] : memref<1x8x8x3xf32, #tpu.memory_space<vmem>>, vector<1x8x8x3xf32>
    %66 = vector.shape_cast %65 : vector<1x8x8x3xf32> to vector<8x8x3xf32>
    %67 = vector.shape_cast %64 : vector<8x8x3xf32> to vector<1x8x8x3xf32>
    tpu.vector_store %arg6[%c0_16, %c0_17, %c0_18, %c0_19], %67 {strides = array<i32>} : memref<1x8x8x3xf32, #tpu.memory_space<vmem>>, vector<1x8x8x3xf32>,
    return
  }
  func.func @transform_0(%arg0: i32) -> (i32, i32, i32) {
    %c0_i32 = arith.constant 0 : i32
    %c0_i32_0 = arith.constant 0 : i32
    %c0_i32_1 = arith.constant 0 : i32
    return %arg0, %c0_i32, %c0_i32_0 : i32, i32, i32
  }
  func.func @transform_1(%arg0: i32) -> (i32, i32) {
    %c0_i32 = arith.constant 0 : i32
    %c0_i32_0 = arith.constant 0 : i32
    %c0_i32_1 = arith.constant 0 : i32
    return %c0_i32, %c0_i32_0 : i32, i32
  }
  func.func @transform_2(%arg0: i32) -> (i32, i32) {
    %c0_i32 = arith.constant 0 : i32
    %c0_i32_0 = arith.constant 0 : i32
    %c0_i32_1 = arith.constant 0 : i32
    return %c0_i32, %c0_i32_0 : i32, i32
  }
  func.func @transform_3(%arg0: i32) -> (i32, i32) {
    %c0_i32 = arith.constant 0 : i32
    %c0_i32_0 = arith.constant 0 : i32
    %c0_i32_1 = arith.constant 0 : i32
    return %c0_i32, %c0_i32_0 : i32, i32
  }
  func.func @transform_4(%arg0: i32) -> (i32, i32) {
    %c0_i32 = arith.constant 0 : i32
    %c0_i32_0 = arith.constant 0 : i32
    %c0_i32_1 = arith.constant 0 : i32
    return %c0_i32, %c0_i32_0 : i32, i32
  }
  func.func @transform_5(%arg0: i32) -> (i32, i32, i32, i32) {
    %c0_i32 = arith.constant 0 : i32
    %c0_i32_0 = arith.constant 0 : i32
    %c0_i32_1 = arith.constant 0 : i32
    %c0_i32_2 = arith.constant 0 : i32
    return %arg0, %c0_i32, %c0_i32_0, %c0_i32_1 : i32, i32, i32, i32
  }
}

</mosaic_0001>

<bundles_post_ra>
// kernel: tpu_custom_call.1
= control target key start
LH: loop header
LB: loop body
LE: loop exit
PB: predicated region body
PF: predicated region fallthrough
CT: control target
= control target key end

     0   :  { %s1144_s27 = smov 48   ;;  %s1145_s28 = smov 24   ;;  %vm462_vm0 = vcmask 195584   ;;  %vm473_vm1 = vcmask 392192   ;;  %vm495_vm2 = vcmask 785408   ;;  %vm484_vm3 = vcmask 588800   ;;  %s1628_s1 = inlined_call_operand.vmem [shape: f32[128,24], index: 1, kind: input, shape index: {}]   ;;  %s1629_s0 = inlined_call_operand.vmem [shape: f32[1,240,128], index: 0, kind: input, shape index: {}]   ;;  %s1630_s3 = inlined_call_operand.vmem [shape: f32[128,8], index: 3, kind: input, shape index: {}]   ;;  %s1631_s2 = inlined_call_operand.vmem [shape: f32[1,24], index: 2, kind: input, shape index: {}]   ;;  %s1632_s4 = inlined_call_operand.vmem [shape: f32[1,8], index: 4, kind: input, shape index: {}]   ;;  %s1633_s5 = inlined_call_operand.vmem [shape: f32[1,8,8,3], index: 5, kind: output, shape index: {}]  }
   0x1   :  { %v50_v0 = vld [vmem:[%s1628_s1] sm:$0xff]  ;;  %v51_v1 = vld [vmem:[%s1628_s1 + $0x8] sm:$0xff]  ;;  %v52_v2 = vld [vmem:[%s1628_s1 + $0x10] sm:$0xff]  ;;  %s1147_s12 = smov 96   ;;  %vm506_vm4 = vcmask 982016   ;;  %vm837_vm5 = vcmask 7168  }
   0x2   :  { %v1076_v3 = vpack.c.bf16 %v51_v1, %v50_v0  ;;  %v53_v4 = vld [vmem:[%s1628_s1 + $0x18] sm:$0xff]  ;;  %v54_v6 = vld [vmem:[%s1628_s1 + $0x20] sm:$0xff]  ;;  %v55_v7 = vld [vmem:[%s1628_s1 + $0x28] sm:$0xff]  ;;  %vm846_vm6 = vcmask 15360   ;;  %vm855_vm7 = vcmask 23552  }
   0x3   :  { %v1080_v5 = vpack.c.bf16 %v53_v4, %v52_v2  ;;  %v1084_v8 = vpack.c.bf16 %v55_v7, %v54_v6  ;;  %v20_v9 = vld [vmem:[%s1629_s0] sm:$0xff]  ;;  %v56_v10 = vld [vmem:[%s1628_s1 + $0x30] sm:$0xff]  ;;  %v57_v11 = vld [vmem:[%s1628_s1 + $0x38] sm:$0xff] }
   0x4   :  { %1077 = vmatprep.subr.bf16.mxu0 %v1076_v3  ;;  %984 = vmatprep.mubr.f32.mxu0 %v20_v9  ;;  %v1088_v12 = vpack.c.bf16 %v57_v11, %v56_v10  ;;  %v58_v13 = vld [vmem:[%s1628_s1 + $0x40] sm:$0xff]  ;;  %v59_v14 = vld [vmem:[%s1628_s1 + $0x48] sm:$0xff]  ;;  %v60_v16 = vld [vmem:[%s1628_s1 + $0x50] sm:$0xff] }
   0x5   :  { %1079 = vmatpush3.bf16.msra.mxu0 %v1076_v3  ;;  %v1092_v15 = vpack.c.bf16 %v59_v14, %v58_v13  ;;  %v61_v17 = vld [vmem:[%s1628_s1 + $0x58] sm:$0xff]  ;;  %v62_v19 = vld [vmem:[%s1628_s1 + $0x60] sm:$0xff]  ;;  %v63_v20 = vld [vmem:[%s1628_s1 + $0x68] sm:$0xff] }
   0x6   :  { %1081 = vmatprep.subr.bf16.mxu0 %v1080_v5  ;;  %v1096_v18 = vpack.c.bf16 %v61_v17, %v60_v16  ;;  %v1100_v21 = vpack.c.bf16 %v63_v20, %v62_v19  ;;  %v64_v22 = vld [vmem:[%s1628_s1 + $0x70] sm:$0xff]  ;;  %v65_v23 = vld [vmem:[%s1628_s1 + $0x78] sm:$0xff]  ;;  %v21_v25 = vld [vmem:[%s1629_s0 + $0x8] sm:$0xff]  ;;  %s1146_s1 = smov 72  }
   0x7   :  { %v1104_v24 = vpack.c.bf16 %v65_v23, %v64_v22  ;;  %v22_v26 = vld [vmem:[%s1629_s0 + $0x10] sm:$0xff]  ;;  %v23_v27 = vld [vmem:[%s1629_s0 + $0x18] sm:$0xff]  ;;  %v24_v28 = vld [vmem:[%s1629_s0 + $0x20] sm:$0xff] }
   0x8   :  { %v25_v29 = vld [vmem:[%s1629_s0 + $0x28] sm:$0xff]  ;;  %v26_v30 = vld [vmem:[%s1629_s0 + $0x30] sm:$0xff]  ;;  %v27_v31 = vld [vmem:[%s1629_s0 + $0x38] sm:$0xff] }
   0x9   :  { %1083 = vmatpush3.bf16.msra.mxu0 %v1080_v5  ;;  %v28_v32 = vld [vmem:[%s1629_s0 + $0x40] sm:$0xff]  ;;  %v29_v33 = vld [vmem:[%s1629_s0 + $0x48] sm:$0xff]  ;;  %v30_v34 = vld [vmem:[%s1629_s0 + $0x50] sm:$0xff] }
   0xa   :  { %1085 = vmatprep.subr.bf16.mxu0 %v1084_v8  ;;  %v31_v35 = vld [vmem:[%s1629_s0 + $0x58] sm:$0xff]  ;;  %v32_v36 = vld [vmem:[%s1629_s0 + $0x60] sm:$0xff]  ;;  %v33_v37 = vld [vmem:[%s1629_s0 + $0x68] sm:$0xff] }
   0xb   :  { %v34_v38 = vld [vmem:[%s1629_s0 + $0x70] sm:$0xff]  ;;  %v35_v39 = vld [vmem:[%s1629_s0 + $0x78] sm:$0xff]  ;;  %v36_v40 = vld [vmem:[%s1629_s0 + $0x80] sm:$0xff] }
   0xc   :  { %v37_v41 = vld [vmem:[%s1629_s0 + $0x88] sm:$0xff]  ;;  %v38_v42 = vld [vmem:[%s1629_s0 + $0x90] sm:$0xff]  ;;  %v39_v43 = vld [vmem:[%s1629_s0 + $0x98] sm:$0xff] }
   0xd   :  { %1087 = vmatpush3.bf16.msra.mxu0 %v1084_v8  ;;  %v40_v44 = vld [vmem:[%s1629_s0 + $0xa0] sm:$0xff]  ;;  %v41_v45 = vld [vmem:[%s1629_s0 + $0xa8] sm:$0xff]  ;;  %v42_v46 = vld [vmem:[%s1629_s0 + $0xb0] sm:$0xff] }
   0xe   :  { %1089 = vmatprep.subr.bf16.mxu0 %v1088_v12  ;;  %v43_v47 = vld [vmem:[%s1629_s0 + $0xb8] sm:$0xff]  ;;  %v44_v48 = vld [vmem:[%s1629_s0 + $0xc0] sm:$0xff]  ;;  %v45_v49 = vld [vmem:[%s1629_s0 + $0xc8] sm:$0xff] }
   0xf   :  { %v46_v50 = vld [vmem:[%s1629_s0 + $0xd0] sm:$0xff]  ;;  %v47_v51 = vld [vmem:[%s1629_s0 + $0xd8] sm:$0xff]  ;;  %v48_v52 = vld [vmem:[%s1629_s0 + $0xe0] sm:$0xff] }
  0x10   :  { %v49_v53 = vld [vmem:[%s1629_s0 + $0xe8] sm:$0xff]  ;;  %v517_v54 = vld [vmem:[%s1630_s3] sm:$0xff]  ;;  %v519_v11 = vld [vmem:[%s1630_s3 + $0x10] sm:$0xff] }
  0x11   :  { %1091 = vmatpush3.bf16.msra.mxu0 %v1088_v12  ;;  %v518_v55 = vld [vmem:[%s1630_s3 + $0x8] sm:$0xff]  ;;  %v1325_v57 = vld [vmem:[%s1631_s2] ss:$0 sm:$0xff]  ;;  %v520_v12 = vld [vmem:[%s1630_s3 + $0x18] sm:$0xff] }
  0x12   :  { %1093 = vmatprep.subr.bf16.mxu0 %v1092_v15  ;;  %v1108_v56 = vpack.c.bf16 %v518_v55, %v517_v54  ;;  %v1112_v13 = vpack.c.bf16 %v520_v12, %v519_v11  ;;  %v522_v19 = vld [vmem:[%s1630_s3 + $0x28] sm:$0xff] }
  0x14   :  { %1109 = vmatprep.subr.bf16.mxu1 %v1108_v56 }
  0x15   :  { %1095 = vmatpush3.bf16.msra.mxu0 %v1092_v15  ;;  %1111 = vmatpush3.bf16.msra.mxu1 %v1108_v56 }
  0x16   :  { %1097 = vmatprep.subr.bf16.mxu0 %v1096_v18  ;;  %1113 = vmatprep.subr.bf16.mxu1 %v1112_v13 }
  0x19   :  { %1099 = vmatpush3.bf16.msra.mxu0 %v1096_v18  ;;  %1115 = vmatpush3.bf16.msra.mxu1 %v1112_v13  ;;  %v521_v18 = vld [vmem:[%s1630_s3 + $0x20] sm:$0xff] }
  0x1a   :  { %1101 = vmatprep.subr.bf16.mxu0 %v1100_v21  ;;  %v1116_v22 = vpack.c.bf16 %v522_v19, %v521_v18 }
  0x1c   :  { %1117 = vmatprep.subr.bf16.mxu1 %v1116_v22 }
  0x1d   :  { %1103 = vmatpush3.bf16.msra.mxu0 %v1100_v21  ;;  %1119 = vmatpush3.bf16.msra.mxu1 %v1116_v22 }
  0x1e   :  { %1105 = vmatprep.subr.bf16.mxu0 %v1104_v24 }
  0x21   :  { %1107 = vmatpush3.bf16.msra.mxu0 %v1104_v24 }
  0x24   :  { %985 = vmatmul.mubr.f32.vlgmr.msra.gmra.mrb[0].mxu0 %v21_v25 }
  0x25   :  { %987 = vmatprep.mubr.f32.mxu0 %v22_v26 }
  0x28   :  { %988 = vmatmul.mubr.f32.gmra.mrb[2].mxu0 %v23_v27 }
  0x29   :  { %990 = vmatprep.mubr.f32.mxu0 %v24_v28 }
  0x2c   :  { %991 = vmatmul.mubr.f32.gmra.mrb[4].mxu0 %v25_v29  ;;  %v523_v29 = vld [vmem:[%s1630_s3 + $0x30] sm:$0xff] }
  0x2d   :  { %993 = vmatprep.mubr.f32.mxu0 %v26_v30  ;;  %v524_v30 = vld [vmem:[%s1630_s3 + $0x38] sm:$0xff] }
  0x30   :  { %994 = vmatmul.mubr.f32.gmra.mrb[6].mxu0 %v27_v31 }
  0x31   :  { %996 = vmatprep.mubr.f32.mxu0 %v28_v32 }
  0x34   :  { %997 = vmatmul.mubr.f32.gmra.mrb[8].mxu0 %v29_v33  ;;  %v1120_v33 = vpack.c.bf16 %v524_v30, %v523_v29 }
  0x35   :  { %999 = vmatprep.mubr.f32.mxu0 %v30_v34 }
  0x36   :  { %1121 = vmatprep.subr.bf16.mxu1 %v1120_v33 }
  0x37   :  { %1123 = vmatpush3.bf16.msra.mxu1 %v1120_v33 }
  0x38   :  { %1000 = vmatmul.mubr.f32.gmra.mrb[10].mxu0 %v31_v35 }
  0x39   :  { %1002 = vmatprep.mubr.f32.mxu0 %v32_v36 }
  0x3c   :  { %1003 = vmatmul.mubr.f32.gmra.mrb[12].mxu0 %v33_v37 }
  0x3d   :  { %1005 = vmatprep.mubr.f32.mxu0 %v34_v38 }
  0x40   :  { %1006 = vmatmul.mubr.f32.gmra.mrb[14].mxu0 %v35_v39 }
  0x41   :  { %1008 = vmatprep.mubr.f32.mxu0 %v36_v40 }
  0x44   :  { %1009 = vmatmul.mubr.f32.gmra.mrb[16].mxu0 %v37_v41 }
  0x45   :  { %1011 = vmatprep.mubr.f32.mxu0 %v38_v42  ;;  %v525_v42 = vld [vmem:[%s1630_s3 + $0x40] sm:$0xff] }
  0x48   :  { %1012 = vmatmul.mubr.f32.gmra.mrb[18].mxu0 %v39_v43  ;;  %v526_v43 = vld [vmem:[%s1630_s3 + $0x48] sm:$0xff] }
  0x49   :  { %1014 = vmatprep.mubr.f32.mxu0 %v40_v44 }
  0x4c   :  { %1015 = vmatmul.mubr.f32.gmra.mrb[20].mxu0 %v41_v45 }
  0x4d   :  { %1017 = vmatprep.mubr.f32.mxu0 %v42_v46 }
  0x50   :  { %1018 = vmatmul.mubr.f32.gmra.mrb[22].mxu0 %v43_v47  ;;  %v1124_v47 = vpack.c.bf16 %v526_v43, %v525_v42 }
  0x51   :  { %1020 = vmatprep.mubr.f32.mxu0 %v44_v48 }
  0x52   :  { %1125 = vmatprep.subr.bf16.mxu1 %v1124_v47 }
  0x53   :  { %1127 = vmatpush3.bf16.msra.mxu1 %v1124_v47 }
  0x54   :  { %1021 = vmatmul.mubr.f32.gmra.mrb[24].mxu0 %v45_v49 }
  0x55   :  { %1023 = vmatprep.mubr.f32.mxu0 %v46_v50 }
  0x58   :  { %1024 = vmatmul.mubr.f32.gmra.mrb[26].mxu0 %v47_v51 }
  0x59   :  { %1026 = vmatprep.mubr.f32.mxu0 %v48_v52 }
  0x5c   :  { %1027 = vmatmul.mubr.f32.gmra.mrb[28].mxu0 %v49_v53 }
  0xf7   :  { %v986_v58 = vpop.f32.mrb[0].mxu0 }
  0xf8   :  { %v139_v59 = vpop.f32.mrb[1].mxu0  ;;  %v145_v20 = vadd.f32 %v986_v58, %v1325_v57  ;;  %v527_v58 = vld [vmem:[%s1630_s3 + $0x50] sm:$0xff] }
  0xf9   :  { %v140_v60 = vadd.f32 %v1325_v57, %v139_v59  ;;  %v528_v59 = vld [vmem:[%s1630_s3 + $0x58] sm:$0xff] }
  0xfb   :  { %v989_v61 = vpop.f32.mrb[2].mxu0 }
  0xfc   :  { %v149_v62 = vpop.f32.mrb[3].mxu0  ;;  %v155_v31 = vadd.f32 %v989_v61, %v1325_v57 }
  0xfd   :  { %v150_v24 = vadd.f32 %v1325_v57, %v149_v62 }
  0xff   :  { %v992_v63 = vpop.f32.mrb[4].mxu0 }
 0x100   :  { %v159_v0 = vpop.f32.mrb[5].mxu0  ;;  %v165_v44 = vadd.f32 %v992_v63, %v1325_v57  ;;  %v1128_v63 = vpack.c.bf16 %v528_v59, %v527_v58 }
 0x101   :  { %v160_v36 = vadd.f32 %v1325_v57, %v159_v0 }
 0x102   :  { %1129 = vmatprep.subr.bf16.mxu1 %v1128_v63 }
 0x103   :  { %v1328_v1 = vpop.f32.mrb[6].mxu0  ;;  %1131 = vmatpush3.bf16.msra.mxu1 %v1128_v63 }
 0x104   :  { %v169_v2 = vpop.f32.mrb[7].mxu0  ;;  %v175_v54 = vadd.f32 %v1328_v1, %v1325_v57 }
 0x105   :  { %v170_v50 = vadd.f32 %v1325_v57, %v169_v2 }
 0x107   :  { %v1330_v3 = vpop.f32.mrb[8].mxu0 }
 0x108   :  { %v1332_v4 = vpop.f32.mrb[9].mxu0 }
 0x109   :  { %v180_v2 = vadd.f32 %v1325_v57, %v1332_v4  ;;  %v529_v4 = vld [vmem:[%s1630_s3 + $0x60] sm:$0xff] }
 0x10b   :  { %v1334_v5 = vpop.f32.mrb[10].mxu0 }
 0x10c   :  { %v1336_v6 = vpop.f32.mrb[11].mxu0 }
 0x10f   :  { %v1004_v7 = vpop.f32.mrb[12].mxu0 }
 0x110   :  { %v1339_v8 = vadd.f32 %v1004_v7, %v1325_v57  ;;  %v199_v9 = vpop.f32.mrb[13].mxu0 }
 0x111   :  { %v1342_v10 = vadd.f32 %v1325_v57, %v199_v9 }
 0x113   :  { %v1007_v14 = vpop.f32.mrb[14].mxu0 }
 0x114   :  { %v215_v15 = vadd.f32 %v1007_v14, %v1325_v57  ;;  %v209_v16 = vpop.f32.mrb[15].mxu0  ;;  %v530_v14 = vld [vmem:[%s1630_s3 + $0x68] sm:$0xff] }
 0x115   :  { %v1352_v17 = vadd.f32 %v1325_v57, %v209_v16  ;;  %v1132_v18 = vpack.c.bf16 %v530_v14, %v529_v4 }
 0x116   :  { %v287_v21 = vmax.f32 %v140_v60, %v215_v15  ;;  %v185_v15 = vadd.f32 %v1330_v3, %v1325_v57 }
 0x117   :  { %v1010_v23 = vpop.f32.mrb[16].mxu0  ;;  %1133 = vmatprep.subr.bf16.mxu1 %v1132_v18 }
 0x118   :  { %v1362_v25 = vmax.f32 %v287_v21, %v145_v20  ;;  %v225_v26 = vadd.f32 %v1010_v23, %v1325_v57  ;;  %v219_v27 = vpop.f32.mrb[17].mxu0  ;;  %v190_v21 = vadd.f32 %v1325_v57, %v1336_v6  ;;  %v532_v6 = vld [vmem:[%s1630_s3 + $0x78] sm:$0xff]  ;;  %1135 = vmatpush3.bf16.msra.mxu1 %v1132_v18 }
 0x119   :  { %v220_v28 = vadd.f32 %v1325_v57, %v219_v27  ;;  %v531_v27 = vld [vmem:[%s1630_s3 + $0x70] sm:$0xff] }
 0x11a   :  { %v289_v32 = vmax.f32 %v150_v24, %v225_v26  ;;  %v315_v63 = vmax.f32 %v1362_v25, 0.0 }
 0x11b   :  { %v288_v34 = vmax.f32 %v145_v20, %v220_v28  ;;  %v1013_v35 = vpop.f32.mrb[18].mxu0  ;;  %v195_v28 = vadd.f32 %v1334_v5, %v1325_v57 }
 0x11c   :  { %v235_v37 = vadd.f32 %v1013_v35, %v1325_v57  ;;  %v229_v38 = vpop.f32.mrb[19].mxu0  ;;  %v303_v39 = vmax.f32 %v289_v32, %v155_v31 }
 0x11d   :  { %v230_v40 = vadd.f32 %v1325_v57, %v229_v38  ;;  %v1376_v41 = vmax.f32 %v288_v34, %v150_v24 }
 0x11e   :  { %v291_v45 = vmax.f32 %v160_v36, %v235_v37  ;;  %v1385_v46 = vmax.f32 %v303_v39, 0.0 }
 0x11f   :  { %v290_v48 = vmax.f32 %v155_v31, %v230_v40  ;;  %v1016_v49 = vpop.f32.mrb[20].mxu0  ;;  %v316_v62 = vmax.f32 %v1376_v41, 0.0  ;;  %v1136_v31 = vpack.c.bf16 %v532_v6, %v531_v27 }
 0x120   :  { %v305_v51 = vmax.f32 %v291_v45, %v165_v44  ;;  %v245_v52 = vadd.f32 %v1016_v49, %v1325_v57  ;;  %v239_v53 = vpop.f32.mrb[21].mxu0  ;;  %370 = vrot.lane.b32.xlu1 %v1385_v46, %s1144_s27  ;;  %341 = vrot.lane.b32.xlu0 %v1385_v46, %s1145_s28 }
 0x121   :  { %v304_v55 = vmax.f32 %v290_v48, %v160_v36  ;;  %v240_v56 = vadd.f32 %v1325_v57, %v239_v53  ;;  %1137 = vmatprep.subr.bf16.mxu1 %v1136_v31 }
 0x122   :  { %v1402_v60 = vmax.f32 %v305_v51, 0.0  ;;  %v293_v61 = vmax.f32 %v170_v50, %v245_v52  ;;  %1139 = vmatpush3.bf16.msra.mxu1 %v1136_v31 }
 0x123   :  { %v292_v0 = vmax.f32 %v165_v44, %v240_v56  ;;  %v1019_v1 = vpop.f32.mrb[22].mxu0  ;;  %v1438_v29 = vmax.f32 %v304_v55, 0.0 }
 0x124   :  { %v307_v7 = vmax.f32 %v293_v61, %v175_v54  ;;  %v255_v9 = vadd.f32 %v1019_v1, %v1325_v57  ;;  %v249_v11 = vpop.f32.mrb[23].mxu0  ;;  %403 = vrot.lane.b32.xlu1 %v1402_v60, %s1146_s1  ;;  %339 = vrot.lane.b32.xlu0 %v316_v62, %s1145_s28 }
 0x125   :  { %v306_v12 = vmax.f32 %v292_v0, %v170_v50  ;;  %v250_v13 = vadd.f32 %v1325_v57, %v249_v11 }
 0x126   :  { %v295_v16 = vmax.f32 %v180_v2, %v255_v9  ;;  %v1454_v47 = vmax.f32 %v307_v7, 0.0 }
 0x127   :  { %v294_v19 = vmax.f32 %v175_v54, %v250_v13  ;;  %v1022_v20 = vpop.f32.mrb[24].mxu0 }
 0x128   :  { %v309_v22 = vmax.f32 %v295_v16, %v185_v15  ;;  %v265_v23 = vadd.f32 %v1022_v20, %v1325_v57  ;;  %v259_v24 = vpop.f32.mrb[25].mxu0  ;;  %345 = vrot.lane.b32.xlu1 %v1402_v60, %s1145_s28  ;;  %432 = vrot.lane.b32.xlu0 %v1402_v60, %s1147_s12 }
 0x129   :  { %v308_v3 = vmax.f32 %v294_v19, %v180_v2  ;;  %v260_v26 = vadd.f32 %v1325_v57, %v259_v24 }
 0x12a   :  { %v297_v30 = vmax.f32 %v190_v21, %v265_v23 }
 0x12b   :  { %v296_v32 = vmax.f32 %v185_v15, %v260_v26  ;;  %v1025_v33 = vpop.f32.mrb[26].mxu0 }
 0x12c   :  { %v311_v34 = vmax.f32 %v297_v30, %v195_v28  ;;  %v275_v35 = vadd.f32 %v1025_v33, %v1325_v57  ;;  %v269_v36 = vpop.f32.mrb[27].mxu0  ;;  %372 = vrot.lane.b32.xlu1 %v1438_v29, %s1144_s27  ;;  %374 = vrot.lane.b32.xlu0 %v1402_v60, %s1144_s27 }
 0x12d   :  { %v310_v37 = vmax.f32 %v296_v32, %v190_v21  ;;  %v270_v5 = vadd.f32 %v1325_v57, %v269_v36 }
 0x12e   :  { %v299_v38 = vmax.f32 %v1342_v10, %v275_v35 }
 0x12f   :  { %v298_v39 = vmax.f32 %v195_v28, %v270_v5  ;;  %v1028_v40 = vpop.f32.mrb[28].mxu0  ;;  %v1500_v50 = vmax.f32 %v310_v37, 0.0 }
 0x130   :  { %v279_v42 = vpop.f32.mrb[29].mxu0  ;;  %343 = vrot.lane.b32.xlu1 %v1438_v29, %s1145_s28  ;;  %401 = vrot.lane.b32.xlu0 %v1438_v29, %s1146_s1  ;;  %v313_v43 = vmax.f32 %v299_v38, %v1339_v8 }
 0x131   :  { %v280_v44 = vadd.f32 %v1325_v57, %v279_v42  ;;  %v312_v45 = vmax.f32 %v298_v39, %v1342_v10  ;;  %v1466_v57 = vmax.f32 %v306_v12, 0.0  ;;  %v1486_v10 = vmax.f32 %v308_v3, 0.0 }
 0x132   :  { %v327_v51 = vmax.f32 %v313_v43, 0.0 }
 0x133   :  { %v300_v48 = vmax.f32 %v1339_v8, %v280_v44  ;;  %v1476_v8 = vmax.f32 %v309_v22, 0.0  ;;  %v326_v52 = vmax.f32 %v312_v45, 0.0 }
 0x134   :  { %407 = vrot.lane.b32.xlu1 %v1454_v47, %s1146_s1  ;;  %436 = vrot.lane.b32.xlu0 %v1454_v47, %s1147_s12 }
 0x135   :  { %v314_v49 = vmax.f32 %v300_v48, %v1352_v17  ;;  %v325_v17 = vmax.f32 %v311_v34, 0.0 }
 0x137   :  { %v328_v53 = vmax.f32 %v314_v49, 0.0 }
 0x138   :  { %349 = vrot.lane.b32.xlu1 %v1454_v47, %s1145_s28  ;;  %378 = vrot.lane.b32.xlu0 %v1454_v47, %s1144_s27 }
 0x13c   :  { %376 = vrot.lane.b32.xlu1 %v1466_v57, %s1144_s27  ;;  %434 = vrot.lane.b32.xlu0 %v1466_v57, %s1147_s12 }
 0x140   :  { %347 = vrot.lane.b32.xlu1 %v1466_v57, %s1145_s28  ;;  %405 = vrot.lane.b32.xlu0 %v1466_v57, %s1146_s1 }
 0x144   :  { %411 = vrot.lane.b32.xlu1 %v1476_v8, %s1146_s1  ;;  %440 = vrot.lane.b32.xlu0 %v1476_v8, %s1147_s12 }
 0x148   :  { %353 = vrot.lane.b32.xlu1 %v1476_v8, %s1145_s28  ;;  %382 = vrot.lane.b32.xlu0 %v1476_v8, %s1144_s27 }
 0x14c   :  { %380 = vrot.lane.b32.xlu1 %v1486_v10, %s1144_s27  ;;  %438 = vrot.lane.b32.xlu0 %v1486_v10, %s1147_s12 }
 0x150   :  { %351 = vrot.lane.b32.xlu1 %v1486_v10, %s1145_s28  ;;  %409 = vrot.lane.b32.xlu0 %v1486_v10, %s1146_s1 }
 0x154   :  { %415 = vrot.lane.b32.xlu1 %v325_v17, %s1146_s1  ;;  %444 = vrot.lane.b32.xlu0 %v325_v17, %s1147_s12 }
 0x158   :  { %357 = vrot.lane.b32.xlu1 %v325_v17, %s1145_s28  ;;  %386 = vrot.lane.b32.xlu0 %v325_v17, %s1144_s27 }
 0x15c   :  { %384 = vrot.lane.b32.xlu1 %v1500_v50, %s1144_s27  ;;  %442 = vrot.lane.b32.xlu0 %v1500_v50, %s1147_s12 }
 0x160   :  { %355 = vrot.lane.b32.xlu1 %v1500_v50, %s1145_s28  ;;  %413 = vrot.lane.b32.xlu0 %v1500_v50, %s1146_s1 }
 0x164   :  { %419 = vrot.lane.b32.xlu1 %v327_v51, %s1146_s1  ;;  %446 = vrot.lane.b32.xlu0 %v326_v52, %s1147_s12 }
 0x168   :  { %388 = vrot.lane.b32.xlu1 %v326_v52, %s1144_s27  ;;  %417 = vrot.lane.b32.xlu0 %v326_v52, %s1146_s1 }
 0x16c   :  { %450 = vrot.lane.b32.xlu1 %v328_v53, %s1147_s12  ;;  %448 = vrot.lane.b32.xlu0 %v327_v51, %s1147_s12 }
 0x192   :  { %v371_v54 = vpop.permute.xlu1 %370  ;;  %v342_v55 = vpop.permute.xlu0 %341 }
 0x193   :  { %v464_v14 = vsel %vm462_vm0, %v316_v62, %v342_v55 }
 0x196   :  { %v404_v56 = vpop.permute.xlu1 %403  ;;  %v340_v58 = vpop.permute.xlu0 %339 }
 0x197   :  { %v463_v2 = vsel %vm462_vm0, %v315_v63, %v340_v58 }
 0x198   :  { %v474_v11 = vsel %vm473_vm1, %v463_v2, %v371_v54 }
 0x19a   :  { %v346_v59 = vpop.permute.xlu1 %345  ;;  %v433_v61 = vpop.permute.xlu0 %432 }
 0x19b   :  { %v466_v28 = vsel %vm462_vm0, %v1438_v29, %v346_v59 }
 0x19e   :  { %v373_v0 = vpop.permute.xlu1 %372  ;;  %v375_v1 = vpop.permute.xlu0 %374 }
 0x19f   :  { %v475_v18 = vsel %vm473_vm1, %v464_v14, %v373_v0 }
 0x1a0   :  { %v486_v20 = vsel %vm484_vm3, %v475_v18, %v404_v56 }
 0x1a2   :  { %v344_v7 = vpop.permute.xlu1 %343  ;;  %v402_v9 = vpop.permute.xlu0 %401 }
 0x1a3   :  { %v485_v12 = vsel %vm484_vm3, %v474_v11, %v402_v9  ;;  %v465_v22 = vsel %vm462_vm0, %v1385_v46, %v344_v7 }
 0x1a4   :  { %v496_v13 = vsel %vm495_vm2, %v485_v12, %v433_v61  ;;  %v476_v41 = vsel %vm473_vm1, %v465_v22, %v375_v1 }
 0x1a5   :  { %1061 = vmatprep.mubr.msk.f32.mxu1 %vm506_vm4, %v496_v13 }
 0x1a6   :  { %v408_v25 = vpop.permute.xlu1 %407  ;;  %v437_v4 = vpop.permute.xlu0 %436 }
 0x1aa   :  { %v350_v15 = vpop.permute.xlu1 %349  ;;  %v379_v16 = vpop.permute.xlu0 %378 }
 0x1ab   :  { %v468_v43 = vsel %vm462_vm0, %v1466_v57, %v350_v15 }
 0x1ae   :  { %v377_v19 = vpop.permute.xlu1 %376  ;;  %v435_v21 = vpop.permute.xlu0 %434 }
 0x1af   :  { %v497_v23 = vsel %vm495_vm2, %v486_v20, %v435_v21  ;;  %v477_v31 = vsel %vm473_vm1, %v466_v28, %v377_v19 }
 0x1b0   :  { %1062 = vmatmul.mubr.msk.f32.vlgmr.msra.gmra.mrb[0].mxu1 %vm506_vm4, %v497_v23  ;;  %v488_v33 = vsel %vm484_vm3, %v477_v31, %v408_v25 }
 0x1b2   :  { %v348_v24 = vpop.permute.xlu1 %347  ;;  %v406_v3 = vpop.permute.xlu0 %405 }
 0x1b3   :  { %v487_v62 = vsel %vm484_vm3, %v476_v41, %v406_v3  ;;  %v467_v35 = vsel %vm462_vm0, %v1402_v60, %v348_v24 }
 0x1b4   :  { %v498_v26 = vsel %vm495_vm2, %v487_v62, %v437_v4  ;;  %v478_v5 = vsel %vm473_vm1, %v467_v35, %v379_v16 }
 0x1b5   :  { %1064 = vmatprep.mubr.msk.f32.mxu1 %vm506_vm4, %v498_v26  ;;  %v669_v26 = vlaneseq }
 0x1b6   :  { %v412_v27 = vpop.permute.xlu1 %411  ;;  %v441_v6 = vpop.permute.xlu0 %440 }
 0x1ba   :  { %v354_v46 = vpop.permute.xlu1 %353  ;;  %v383_v30 = vpop.permute.xlu0 %382 }
 0x1bb   :  { %v470_v53 = vsel %vm462_vm0, %v1486_v10, %v354_v46 }
 0x1be   :  { %v381_v32 = vpop.permute.xlu1 %380  ;;  %v439_v34 = vpop.permute.xlu0 %438 }
 0x1bf   :  { %v499_v36 = vsel %vm495_vm2, %v488_v33, %v439_v34  ;;  %v479_v45 = vsel %vm473_vm1, %v468_v43, %v381_v32 }
 0x1c0   :  { %1065 = vmatmul.mubr.msk.f32.gmra.mrb[2].mxu1 %vm506_vm4, %v499_v36  ;;  %v490_v49 = vsel %vm484_vm3, %v479_v45, %v412_v27  ;;  %v670_v27 = vshrl.u32 %v669_v26, 7 }
 0x1c2   :  { %v352_v37 = vpop.permute.xlu1 %351  ;;  %v410_v38 = vpop.permute.xlu0 %409  ;;  %v678_v31 = vsub.s32 1, %v670_v27  ;;  %v671_v35 = vsub.s32 0, %v670_v27  ;;  %v699_v45 = vsub.s32 4, %v670_v27 }
 0x1c3   :  { %v489_v29 = vsel %vm484_vm3, %v478_v5, %v410_v38  ;;  %v469_v51 = vsel %vm462_vm0, %v1454_v47, %v352_v37  ;;  %v692_v5 = vsub.s32 3, %v670_v27 }
 0x1c4   :  { %v500_v39 = vsel %vm495_vm2, %v489_v29, %v441_v6  ;;  %v480_v57 = vsel %vm473_vm1, %v469_v51, %v383_v30 }
 0x1c5   :  { %1067 = vmatprep.mubr.msk.f32.mxu1 %vm506_vm4, %v500_v39 }
 0x1c6   :  { %v416_v40 = vpop.permute.xlu1 %415  ;;  %v445_v42 = vpop.permute.xlu0 %444 }
 0x1ca   :  { %v358_v60 = vpop.permute.xlu1 %357  ;;  %v387_v44 = vpop.permute.xlu0 %386 }
 0x1cb   :  { %v472_v10 = vsel %vm462_vm0, %v1500_v50, %v358_v60 }
 0x1ce   :  { %v385_v48 = vpop.permute.xlu1 %384  ;;  %v443_v17 = vpop.permute.xlu0 %442 }
 0x1cf   :  { %v501_v52 = vsel %vm495_vm2, %v490_v49, %v443_v17  ;;  %v481_v56 = vsel %vm473_vm1, %v470_v53, %v385_v48 }
 0x1d0   :  { %1068 = vmatmul.mubr.msk.f32.gmra.mrb[4].mxu1 %vm506_vm4, %v501_v52  ;;  %v492_v61 = vsel %vm484_vm3, %v481_v56, %v416_v40  ;;  %v685_v40 = vsub.s32 2, %v670_v27 }
 0x1d2   :  { %v356_v54 = vpop.permute.xlu1 %355  ;;  %v414_v55 = vpop.permute.xlu0 %413 }
 0x1d3   :  { %v491_v58 = vsel %vm484_vm3, %v480_v57, %v414_v55  ;;  %v471_v1 = vsel %vm462_vm0, %v1476_v8, %v356_v54  ;;  %v869_v8 = vld [vmem:[%s1632_s4] ss:$0 sm:$0xff]  ;;  %v720_v57 = vsub.s32 7, %v670_v27  ;;  %v713_v55 = vsub.s32 6, %v670_v27 }
 0x1d4   :  { %v502_v59 = vsel %vm495_vm2, %v491_v58, %v445_v42  ;;  %v482_v11 = vsel %vm473_vm1, %v471_v1, %v387_v44  ;;  %v706_v44 = vsub.s32 5, %v670_v27 }
 0x1d5   :  { %1070 = vmatprep.mubr.msk.f32.mxu1 %vm506_vm4, %v502_v59 }
 0x1d6   :  { %v420_v47 = vpop.permute.xlu1 %419  ;;  %v447_v63 = vpop.permute.xlu0 %446 }
 0x1d7   :  { %v503_v0 = vsel %vm495_vm2, %v492_v61, %v447_v63 }
 0x1d8   :  { %1071 = vmatmul.mubr.msk.f32.gmra.mrb[6].mxu1 %vm506_vm4, %v503_v0 }
 0x1da   :  { %v389_v2 = vpop.permute.xlu1 %388  ;;  %v418_v7 = vpop.permute.xlu0 %417 }
 0x1db   :  { %v483_v9 = vsel %vm473_vm1, %v472_v10, %v389_v2  ;;  %v493_v12 = vsel %vm484_vm3, %v482_v11, %v418_v7 }
 0x1dc   :  { %v494_v13 = vsel %vm484_vm3, %v483_v9, %v420_v47 }
 0x1de   :  { %v451_v25 = vpop.permute.xlu1 %450  ;;  %v449_v4 = vpop.permute.xlu0 %448 }
 0x1df   :  { %v505_v14 = vsel %vm495_vm2, %v494_v13, %v451_v25  ;;  %v504_v15 = vsel %vm495_vm2, %v493_v12, %v449_v4 }
 0x1e0   :  { %1073 = vmatprep.mubr.msk.f32.mxu1 %vm506_vm4, %v504_v15 }
 0x1e1   :  { %1074 = vmatmul.mubr.msk.f32.gmra.mrb[8].mxu1 %vm506_vm4, %v505_v14 }
 0x283   :  { %v1063_v50 = vpop.f32.mrb[0].mxu1 }
 0x284   :  { %v612_v16 = vadd.f32 %v1063_v50, %v869_v8  ;;  %v606_v18 = vpop.f32.mrb[1].mxu1 }
 0x285   :  { %v607_v19 = vadd.f32 %v869_v8, %v606_v18 }
 0x287   :  { %v654_v20 = vmax.f32 %v607_v19, %v612_v16 }
 0x293   :  { %v1066_v21 = vpop.f32.mrb[2].mxu1 }
 0x294   :  { %v622_v22 = vadd.f32 %v1066_v21, %v869_v8  ;;  %v616_v23 = vpop.f32.mrb[3].mxu1 }
 0x295   :  { %v617_v24 = vadd.f32 %v869_v8, %v616_v23 }
 0x297   :  { %v655_v41 = vmax.f32 %v654_v20, %v617_v24  ;;  %v659_v3 = vmax.f32 %v617_v24, %v622_v22 }
 0x299   :  { %v656_v62 = vmax.f32 %v655_v41, %v622_v22 }
 0x2a3   :  { %v1069_v6 = vpop.f32.mrb[4].mxu1 }
 0x2a4   :  { %v632_v28 = vadd.f32 %v1069_v6, %v869_v8  ;;  %v626_v46 = vpop.f32.mrb[5].mxu1 }
 0x2a5   :  { %v627_v30 = vadd.f32 %v869_v8, %v626_v46 }
 0x2a7   :  { %v657_v32 = vmax.f32 %v656_v62, %v627_v30  ;;  %v660_v33 = vmax.f32 %v659_v3, %v627_v30  ;;  %v664_v34 = vmax.f32 %v627_v30, %v632_v28 }
 0x2a9   :  { %v658_v36 = vmax.f32 %v657_v32, 0.0  ;;  %v661_v37 = vmax.f32 %v660_v33, %v632_v28 }
 0x2ab   :  { %v1072_v38 = vpop.f32.mrb[6].mxu1  ;;  %v679_v29 = vrot.slane %v658_v36, %v678_v31  ;;  %v672_v39 = vrot.slane %v658_v36, %v671_v35  ;;  %v693_v60 = vrot.slane %v658_v36, %v692_v5  ;;  %v686_v51 = vrot.slane %v658_v36, %v685_v40 }
 0x2ac   :  { %v636_v42 = vpop.f32.mrb[7].mxu1  ;;  %v642_v48 = vadd.f32 %v1072_v38, %v869_v8  ;;  %v707_v53 = vrot.slane %v658_v36, %v706_v44  ;;  %v700_v54 = vrot.slane %v658_v36, %v699_v45  ;;  %v721_v61 = vrot.slane %v658_v36, %v720_v57 }
 0x2ad   :  { %v637_v43 = vadd.f32 %v869_v8, %v636_v42  ;;  %681 = vbcast.lane.b32.xlu1 %v679_v29, 256  ;;  %674 = vbcast.lane.b32.xlu0 %v672_v39, 256  ;;  %v714_v63 = vrot.slane %v658_v36, %v713_v55 }
 0x2af   :  { %v662_v49 = vmax.f32 %v661_v37, %v637_v43  ;;  %v665_v17 = vmax.f32 %v664_v34, %v637_v43 }
 0x2b1   :  { %695 = vbcast.lane.b32.xlu1 %v693_v60, 256  ;;  %688 = vbcast.lane.b32.xlu0 %v686_v51, 256  ;;  %v666_v52 = vmax.f32 %v665_v17, %v642_v48  ;;  %v663_v47 = vmax.f32 %v662_v49, 0.0 }
 0x2b3   :  { %v735_v10 = vrot.slane %v663_v47, %v678_v31  ;;  %v728_v1 = vrot.slane %v663_v47, %v671_v35  ;;  %v749_v2 = vrot.slane %v663_v47, %v692_v5  ;;  %v742_v7 = vrot.slane %v663_v47, %v685_v40 }
 0x2b4   :  { %v1075_v56 = vpop.f32.mrb[8].mxu1  ;;  %v763_v9 = vrot.slane %v663_v47, %v706_v44  ;;  %v756_v11 = vrot.slane %v663_v47, %v699_v45  ;;  %v777_v13 = vrot.slane %v663_v47, %v720_v57  ;;  %v770_v25 = vrot.slane %v663_v47, %v713_v55 }
 0x2b5   :  { %v646_v58 = vpop.f32.mrb[9].mxu1  ;;  %709 = vbcast.lane.b32.xlu1 %v707_v53, 256  ;;  %702 = vbcast.lane.b32.xlu0 %v700_v54, 256 }
 0x2b6   :  { %v647_v59 = vadd.f32 %v869_v8, %v646_v58 }
 0x2b8   :  { %v667_v0 = vmax.f32 %v666_v52, %v647_v59 }
 0x2b9   :  { %723 = vbcast.lane.b32.xlu1 %v721_v61, 256  ;;  %716 = vbcast.lane.b32.xlu0 %v714_v63, 256 }
 0x2ba   :  { %v668_v12 = vmax.f32 %v667_v0, 0.0 }
 0x2bc   :  { %v791_v4 = vrot.slane %v668_v12, %v678_v31  ;;  %v784_v14 = vrot.slane %v668_v12, %v671_v35  ;;  %v805_v15 = vrot.slane %v668_v12, %v692_v5  ;;  %v798_v8 = vrot.slane %v668_v12, %v685_v40 }
 0x2bd   :  { %737 = vbcast.lane.b32.xlu1 %v735_v10, 256  ;;  %730 = vbcast.lane.b32.xlu0 %v728_v1, 256  ;;  %v819_v50 = vrot.slane %v668_v12, %v706_v44  ;;  %v812_v16 = vrot.slane %v668_v12, %v699_v45  ;;  %v833_v18 = vrot.slane %v668_v12, %v720_v57 }
 0x2be   :  { %v826_v19 = vrot.slane %v668_v12, %v713_v55 }
 0x2c1   :  { %751 = vbcast.lane.b32.xlu1 %v749_v2, 256  ;;  %744 = vbcast.lane.b32.xlu0 %v742_v7, 256 }
 0x2c5   :  { %765 = vbcast.lane.b32.xlu1 %v763_v9, 256  ;;  %758 = vbcast.lane.b32.xlu0 %v756_v11, 256 }
 0x2c9   :  { %779 = vbcast.lane.b32.xlu1 %v777_v13, 256  ;;  %772 = vbcast.lane.b32.xlu0 %v770_v25, 256 }
 0x2cd   :  { %793 = vbcast.lane.b32.xlu1 %v791_v4, 256  ;;  %786 = vbcast.lane.b32.xlu0 %v784_v14, 256 }
 0x2d1   :  { %807 = vbcast.lane.b32.xlu1 %v805_v15, 256  ;;  %800 = vbcast.lane.b32.xlu0 %v798_v8, 256 }
 0x2d5   :  { %821 = vbcast.lane.b32.xlu1 %v819_v50, 256  ;;  %814 = vbcast.lane.b32.xlu0 %v812_v16, 256 }
 0x2d9   :  { %835 = vbcast.lane.b32.xlu1 %v833_v18, 256  ;;  %828 = vbcast.lane.b32.xlu0 %v826_v19, 256 }
 0x31f   :  { %v682_v20 = vpop.permute.xlu1 %681  ;;  %v675_v21 = vpop.permute.xlu0 %674 }
 0x323   :  { %v696_v22 = vpop.permute.xlu1 %695  ;;  %v689_v23 = vpop.permute.xlu0 %688 }
 0x327   :  { %v710_v24 = vpop.permute.xlu1 %709  ;;  %v703_v41 = vpop.permute.xlu0 %702 }
 0x32b   :  { %v724_v3 = vpop.permute.xlu1 %723  ;;  %v717_v62 = vpop.permute.xlu0 %716 }
 0x32f   :  { %v738_v26 = vpop.permute.xlu1 %737  ;;  %v731_v27 = vpop.permute.xlu0 %730 }
 0x330   :  { %v839_v33 = vsel %vm837_vm5, %v682_v20, %v738_v26  ;;  %v838_v34 = vsel %vm837_vm5, %v675_v21, %v731_v27 }
 0x333   :  { %v752_v6 = vpop.permute.xlu1 %751  ;;  %v745_v28 = vpop.permute.xlu0 %744 }
 0x334   :  { %v841_v38 = vsel %vm837_vm5, %v696_v22, %v752_v6  ;;  %v840_v29 = vsel %vm837_vm5, %v689_v23, %v745_v28 }
 0x337   :  { %v766_v46 = vpop.permute.xlu1 %765  ;;  %v759_v30 = vpop.permute.xlu0 %758 }
 0x338   :  { %v843_v60 = vsel %vm837_vm5, %v710_v24, %v766_v46  ;;  %v842_v44 = vsel %vm837_vm5, %v703_v41, %v759_v30 }
 0x33b   :  { %v780_v31 = vpop.permute.xlu1 %779  ;;  %v773_v32 = vpop.permute.xlu0 %772 }
 0x33c   :  { %v845_v51 = vsel %vm837_vm5, %v724_v3, %v780_v31  ;;  %v844_v52 = vsel %vm837_vm5, %v717_v62, %v773_v32 }
 0x33f   :  { %v794_v35 = vpop.permute.xlu1 %793  ;;  %v787_v36 = vpop.permute.xlu0 %786 }
 0x340   :  { %v848_v37 = vsel %vm846_vm6, %v839_v33, %v794_v35  ;;  %v847_v5 = vsel %vm846_vm6, %v838_v34, %v787_v36 }
 0x341   :  { %857 = vst.msk [vmem:[%s1633_s5 + $0x8] sm:$0xff] %vm855_vm7, %v848_v37  ;;  %856 = vst.msk [vmem:[%s1633_s5] sm:$0xff] %vm855_vm7, %v847_v5 }
 0x343   :  { %v808_v39 = vpop.permute.xlu1 %807  ;;  %v801_v40 = vpop.permute.xlu0 %800 }
 0x344   :  { %v850_v42 = vsel %vm846_vm6, %v841_v38, %v808_v39  ;;  %v849_v43 = vsel %vm846_vm6, %v840_v29, %v801_v40 }
 0x345   :  { %859 = vst.msk [vmem:[%s1633_s5 + $0x18] sm:$0xff] %vm855_vm7, %v850_v42  ;;  %858 = vst.msk [vmem:[%s1633_s5 + $0x10] sm:$0xff] %vm855_vm7, %v849_v43 }
 0x347   :  { %v822_v45 = vpop.permute.xlu1 %821  ;;  %v815_v48 = vpop.permute.xlu0 %814 }
 0x348   :  { %v852_v49 = vsel %vm846_vm6, %v843_v60, %v822_v45  ;;  %v851_v17 = vsel %vm846_vm6, %v842_v44, %v815_v48 }
 0x349   :  { %861 = vst.msk [vmem:[%s1633_s5 + $0x28] sm:$0xff] %vm855_vm7, %v852_v49  ;;  %860 = vst.msk [vmem:[%s1633_s5 + $0x20] sm:$0xff] %vm855_vm7, %v851_v17 }
 0x34b   :  { %v836_v53 = vpop.permute.xlu1 %835  ;;  %v829_v54 = vpop.permute.xlu0 %828 }
 0x34c   :  { %v854_v57 = vsel %vm846_vm6, %v845_v51, %v836_v53  ;;  %v853_v55 = vsel %vm846_vm6, %v844_v52, %v829_v54 }
 0x34d   :  { %863 = vst.msk [vmem:[%s1633_s5 + $0x38] sm:$0xff] %vm855_vm7, %v854_v57  ;;  %862 = vst.msk [vmem:[%s1633_s5 + $0x30] sm:$0xff] %vm855_vm7, %v853_v55 }

</bundles_post_ra>
